<compile_context>
chip_gen: v7x
topology: tpu7x:2x2x1
jax: 0.10.0
libtpu: 0.0.40
codegen_flags: <defaults>
</compile_context>

<pallas_src>
import jax
import jax.numpy as jnp
from jax.experimental import pallas as pl
from jax.experimental.pallas import tpu as pltpu

INPUT_SIZE = 13
HIDDEN_SIZE = 64
OUTPUT_SIZE = 1

_LANE = 128            # lane width: batch tiles must be multiples of this
_MAX_TILE_B = 65536    # ~3.25 MiB of x per block; ~7 MiB double-buffered
                       # -> fits v5e's 16 MiB default scoped VMEM and amortizes
                       #    the ~0.35 us/grid-step overhead on every generation


def _round_up(x, m):
    return ((x + m - 1) // m) * m


def _choose_tiling(batch, max_tile_b=_MAX_TILE_B):
    """Balanced, lane-aligned batch tiling.

    Pick grid_b first (VMEM cap + megacore preference), then size the tile to
    cdiv so padding is capped at grid_b*128 columns instead of ~a full tile.
    """
    b_pad0 = _round_up(max(batch, 1), _LANE)
    # minimum number of tiles imposed by the per-block VMEM cap
    grid_b = pl.cdiv(b_pad0, max_tile_b)
    # v7x: the "parallel" batch axis shards across 2 TensorCores; make sure a
    # large-ish batch is split into >=2 (prefer >=4) tiles. Free on v5e/v6e.
    if b_pad0 >= 4 * _LANE:
        grid_b = max(grid_b, 4)
    elif b_pad0 >= 2 * _LANE:
        grid_b = max(grid_b, 2)
    tile_b = _round_up(pl.cdiv(b_pad0, grid_b), _LANE)
    b_pad = tile_b * grid_b
    return b_pad, tile_b, grid_b


def _mlp_kernel(xT_ref, w1t_ref, b1_ref, w2_ref, b2_ref, o_ref):
    # Layer 1 on the MXU, batch on the lane (N) axis: (64,13) @ (13,TB) -> (64,TB)
    h = jnp.dot(w1t_ref[...], xT_ref[...], preferred_element_type=jnp.float32)
    h = jnp.maximum(h + b1_ref[...], 0.0)          # (64,1) bias bcast over lanes + ReLU (VPU)
    # Layer 2 (N=1): VPU multiply + cross-sublane reduce; stays hidden under the
    # x-stream DMA at these tile sizes, so no need to push it onto the MXU.
    y = jnp.sum(h * w2_ref[...], axis=0, keepdims=True)   # (1, TB), lane-dense
    o_ref[...] = (y + b2_ref[...]).astype(o_ref.dtype)


def linear_regression_forward(x, w1, b1, w2, b2, *, max_tile_b=_MAX_TILE_B):
    """Forward pass of LinearRegression.

    x:  (B, 13) f32
    w1: (13, 64) f32   (pre-transposed nn.Linear weight, i.e. x @ w1 == x @ W1.T)
    b1: (64,)    f32
    w2: (64, 1)  f32
    b2: (1,)     f32
    returns (B, 1) f32
    """
    B = x.shape[0]
    b_pad, tile_b, grid_b = _choose_tiling(B, max_tile_b)

    # One fused pad + transpose (no zero-fill + scatter): (B,13) -> (13, b_pad).
    xT = jnp.pad(x.astype(jnp.float32), ((0, b_pad - B), (0, 0))).T

    w1t = w1.T.astype(jnp.float32)                          # (64, 13)
    b1_col = b1.reshape(HIDDEN_SIZE, 1).astype(jnp.float32)
    w2_col = w2.reshape(HIDDEN_SIZE, OUTPUT_SIZE).astype(jnp.float32)
    b2_2d = b2.reshape(1, OUTPUT_SIZE).astype(jnp.float32)

    weight_bytes = 4 * (HIDDEN_SIZE * INPUT_SIZE + HIDDEN_SIZE
                        + HIDDEN_SIZE * OUTPUT_SIZE + OUTPUT_SIZE)
    cost = pl.CostEstimate(
        flops=2 * b_pad * INPUT_SIZE * HIDDEN_SIZE + 3 * b_pad * HIDDEN_SIZE,
        transcendentals=0,
        bytes_accessed=4 * (INPUT_SIZE * b_pad + b_pad) + weight_bytes,
    )

    out_1b = pl.pallas_call(
        _mlp_kernel,
        out_shape=jax.ShapeDtypeStruct((1, b_pad), jnp.float32),
        grid_spec=pltpu.PrefetchScalarGridSpec(
            num_scalar_prefetch=0,
            grid=(grid_b,),
            in_specs=[
                # x^T streams along the batch grid; weights stay VMEM-resident.
                pl.BlockSpec((INPUT_SIZE, tile_b), lambda i: (0, i)),
                pl.BlockSpec((HIDDEN_SIZE, INPUT_SIZE), lambda i: (0, 0)),
                pl.BlockSpec((HIDDEN_SIZE, 1), lambda i: (0, 0)),
                pl.BlockSpec((HIDDEN_SIZE, OUTPUT_SIZE), lambda i: (0, 0)),
                pl.BlockSpec((1, OUTPUT_SIZE), lambda i: (0, 0)),
            ],
            out_specs=pl.BlockSpec((1, tile_b), lambda i: (0, i)),
        ),
        compiler_params=pltpu.CompilerParams(
            dimension_semantics=("parallel",),   # shard batch across TCs on v7x
        ),
        cost_estimate=cost,
    )(xT, w1t, b1_col, w2_col, b2_2d)

    # Padded columns hold relu(b1)@w2 + b2 (nonzero) -- they are dropped here
    # and nothing downstream may read the raw (1, b_pad) buffer.
    return out_1b[:, :B].T


def init_params(key):
    """Deterministic init mimicking nn.Linear's U(-1/sqrt(fan_in), 1/sqrt(fan_in))."""
    k1, k2, k3, k4 = jax.random.split(key, 4)
    bound1 = 1.0 / jnp.sqrt(float(INPUT_SIZE))
    bound2 = 1.0 / jnp.sqrt(float(HIDDEN_SIZE))
    w1 = jax.random.uniform(k1, (INPUT_SIZE, HIDDEN_SIZE), jnp.float32, -bound1, bound1)
    b1 = jax.random.uniform(k2, (HIDDEN_SIZE,), jnp.float32, -bound1, bound1)
    w2 = jax.random.uniform(k3, (HIDDEN_SIZE, OUTPUT_SIZE), jnp.float32, -bound2, bound2)
    b2 = jax.random.uniform(k4, (OUTPUT_SIZE,), jnp.float32, -bound2, bound2)
    return w1, b1, w2, b2


if __name__ == "__main__":
    key = jax.random.PRNGKey(0)
    kx, kp = jax.random.split(key)

    batch = 8
    x = jax.random.normal(kx, (batch, INPUT_SIZE), dtype=jnp.float32)
    w1, b1, w2, b2 = init_params(kp)

    out = linear_regression_forward(x, w1, b1, w2, b2)
    out = jax.block_until_ready(out)

    # Pure-JAX reference of the same math (x @ W1 + b1 -> ReLU -> @ W2 + b2).
    ref = jnp.maximum(x @ w1 + b1, 0.0) @ w2 + b2
    assert out.shape == (batch, OUTPUT_SIZE)
    assert jnp.allclose(out, ref, atol=1e-5, rtol=1e-5)

    # Exercise a multi-tile batch (grid_b >= 2 path) at a small tile cap so the
    # balanced-tiling / megacore-split logic is covered without a huge demo.
    batch2 = 300
    x2 = jax.random.normal(kx, (batch2, INPUT_SIZE), dtype=jnp.float32)
    out2 = jax.block_until_ready(
        linear_regression_forward(x2, w1, b1, w2, b2, max_tile_b=256))
    ref2 = jnp.maximum(x2 @ w1 + b1, 0.0) @ w2 + b2
    assert out2.shape == (batch2, OUTPUT_SIZE)
    assert jnp.allclose(out2, ref2, atol=1e-5, rtol=1e-5)

    print("KERNEL_OK")
</pallas_src>

<mosaic_0001>
module attributes {stable_mosaic.version = 11 : i64} {
  func.func @_mlp_kernel(%arg0: i32, %arg1: memref<13x128xf32, #tpu.memory_space<vmem>>, %arg2: memref<64x13xf32, #tpu.memory_space<vmem>>, %arg3: memref<64x1xf32, #tpu.memory_space<vmem>>, %arg4: memref<64x1xf32, #tpu.memory_space<vmem>>, %arg5: memref<1x1xf32, #tpu.memory_space<vmem>>, %arg6: memref<1x128xf32, #tpu.memory_space<vmem>>) attributes {dimension_semantics = [#tpu.dimension_semantics<parallel>], iteration_bounds = array<i64: 1>, scalar_prefetch = 0 : i64, scratch_operands = 0 : i64, tpu.core_type = #tpu.core_type<tc>, window_params = [{transform_indices = @transform_0, window_bounds = array<i64: 13, 128>}, {pipeline_mode = #tpu.pipeline_mode<synchronous>, transform_indices = @transform_1, window_bounds = array<i64: 64, 13>}, {pipeline_mode = #tpu.pipeline_mode<synchronous>, transform_indices = @transform_2, window_bounds = array<i64: 64, 1>}, {pipeline_mode = #tpu.pipeline_mode<synchronous>, transform_indices = @transform_3, window_bounds = array<i64: 64, 1>}, {pipeline_mode = #tpu.pipeline_mode<synchronous>, transform_indices = @transform_4, window_bounds = array<i64: 1, 1>}, {transform_indices = @transform_5, window_bounds = array<i64: 1, 128>}]} {
    %c0 = arith.constant 0 : index
    %c0_0 = arith.constant 0 : index
    %0 = vector.load %arg2[%c0, %c0_0] : memref<64x13xf32, #tpu.memory_space<vmem>>, vector<64x13xf32>
    %c0_1 = arith.constant 0 : index
    %c0_2 = arith.constant 0 : index
    %1 = vector.load %arg1[%c0_1, %c0_2] : memref<13x128xf32, #tpu.memory_space<vmem>>, vector<13x128xf32>
    %cst = arith.constant dense<0.000000e+00> : vector<64x128xf32>
    %2 = tpu.matmul %0, %1, %cst {dimension_numbers = #tpu.dot_dimension_numbers<[1], [0], [0], [1], [0, 0, 1, 1], [], []>} : vector<64x13xf32>, vector<13x128xf32>, vector<64x128xf32> -> vector<64x128xf32>
    %c0_3 = arith.constant 0 : index
    %c0_4 = arith.constant 0 : index
    %3 = vector.load %arg3[%c0_3, %c0_4] : memref<64x1xf32, #tpu.memory_space<vmem>>, vector<64x1xf32>
    %4 = vector.broadcast %3 : vector<64x1xf32> to vector<64x128xf32>
    %5 = arith.addf %2, %4 : vector<64x128xf32>
    %cst_5 = arith.constant 0.000000e+00 : f32
    %6 = vector.broadcast %cst_5 : f32 to vector<64x128xf32>
    %7 = arith.maximumf %5, %6 : vector<64x128xf32>
    %c0_6 = arith.constant 0 : index
    %c0_7 = arith.constant 0 : index
    %8 = vector.load %arg4[%c0_6, %c0_7] : memref<64x1xf32, #tpu.memory_space<vmem>>, vector<64x1xf32>
    %9 = vector.broadcast %8 : vector<64x1xf32> to vector<64x128xf32>
    %10 = arith.mulf %7, %9 : vector<64x128xf32>
    %cst_8 = arith.constant dense<0.000000e+00> : vector<128xf32>
    %11 = vector.multi_reduction <add>, %10, %cst_8 [0] : vector<64x128xf32> to vector<128xf32>
    %12 = vector.shape_cast %11 : vector<128xf32> to vector<1x128xf32>
    %c0_9 = arith.constant 0 : index
    %c0_10 = arith.constant 0 : index
    %13 = vector.load %arg5[%c0_9, %c0_10] : memref<1x1xf32, #tpu.memory_space<vmem>>, vector<1x1xf32>
    %14 = vector.broadcast %13 : vector<1x1xf32> to vector<1x128xf32>
    %15 = arith.addf %12, %14 : vector<1x128xf32>
    %c0_11 = arith.constant 0 : index
    %c0_12 = arith.constant 0 : index
    %16 = vector.load %arg6[%c0_11, %c0_12] : memref<1x128xf32, #tpu.memory_space<vmem>>, vector<1x128xf32>
    tpu.vector_store %arg6[%c0_11, %c0_12], %15 {strides = array<i32>} : memref<1x128xf32, #tpu.memory_space<vmem>>, vector<1x128xf32>,
    return
  }
  func.func @transform_0(%arg0: i32) -> (i32, i32) {
    %c0_i32 = arith.constant 0 : i32
    %c0_i32_0 = arith.constant 0 : i32
    return %c0_i32, %arg0 : i32, i32
  }
  func.func @transform_1(%arg0: i32) -> (i32, i32) {
    %c0_i32 = arith.constant 0 : i32
    %c0_i32_0 = arith.constant 0 : i32
    %c0_i32_1 = arith.constant 0 : i32
    return %c0_i32, %c0_i32_0 : i32, i32
  }
  func.func @transform_2(%arg0: i32) -> (i32, i32) {
    %c0_i32 = arith.constant 0 : i32
    %c0_i32_0 = arith.constant 0 : i32
    %c0_i32_1 = arith.constant 0 : i32
    return %c0_i32, %c0_i32_0 : i32, i32
  }
  func.func @transform_3(%arg0: i32) -> (i32, i32) {
    %c0_i32 = arith.constant 0 : i32
    %c0_i32_0 = arith.constant 0 : i32
    %c0_i32_1 = arith.constant 0 : i32
    return %c0_i32, %c0_i32_0 : i32, i32
  }
  func.func @transform_4(%arg0: i32) -> (i32, i32) {
    %c0_i32 = arith.constant 0 : i32
    %c0_i32_0 = arith.constant 0 : i32
    %c0_i32_1 = arith.constant 0 : i32
    return %c0_i32, %c0_i32_0 : i32, i32
  }
  func.func @transform_5(%arg0: i32) -> (i32, i32) {
    %c0_i32 = arith.constant 0 : i32
    %c0_i32_0 = arith.constant 0 : i32
    return %c0_i32, %arg0 : i32, i32
  }
}

</mosaic_0001>

<bundles_post_ra>
// kernel: tpu_custom_call.1
= control target key start
LH: loop header
LB: loop body
LE: loop exit
PB: predicated region body
PF: predicated region fallthrough
CT: control target
= control target key end

     0   :  { %s524_s0 = inlined_call_operand.vmem [shape: f32[13,128], index: 0, kind: input, shape index: {}]   ;;  %s525_s1 = inlined_call_operand.vmem [shape: f32[64,13], index: 1, kind: input, shape index: {}]   ;;  %s526_s2 = inlined_call_operand.vmem [shape: f32[64,1], index: 2, kind: input, shape index: {}]   ;;  %s527_s3 = inlined_call_operand.vmem [shape: f32[64,1], index: 3, kind: input, shape index: {}]   ;;  %s528_s4 = inlined_call_operand.<no memory space> [shape: f32[1,1], index: 4, kind: input, shape index: {}]   ;;  %s529_s5 = inlined_call_operand.hbm [shape: f32[1,128], index: 5, kind: output, shape index: {}]  }
   0x1   :  { %v10_v0 = vstv %s528_s4 }
   0x2   :  { %11 = vst [vmem:[#allocation2] sm:$0x1] %v10_v0 }
   0x3   :  { %v31_v1 = vld [vmem:[%s524_s0] sm:$0xff]  ;;  %v32_v2 = vld [vmem:[%s524_s0 + $0x8] sm:$0x1f]  ;;  %vm106_vm0 = vcmask 1044480   ;;  %vm390_vm1 = vmmov 1   ;;  %vm81_vm3 = vcmask 105472  }
   0x4   :  { %v23_v3 = vld [vmem:[%s525_s1] sm:$0xff]  ;;  %v353_v4 = vpack.c.bf16 %v32_v2, %v31_v1  ;;  %vm354_vm2 = vmpackc.low %vm106_vm0, %vm390_vm1  ;;  %v24_v7 = vld [vmem:[%s525_s1 + $0x8] sm:$0xff]  ;;  %v391_v12 = vmov 0  }
   0x5   :  { %v27_v5 = vld [vmem:[%s525_s1 + $0x20] sm:$0xff]  ;;  %341 = vmatprep.mubr.msk.f32.mxu0 %vm81_vm3, %v23_v3  ;;  %v28_v8 = vld [vmem:[%s525_s1 + $0x28] sm:$0xff]  ;;  %v35_v9 = vld [vmem:[%s526_s2 + $0x10] sm:$0xff]  ;;  %364 = vset.pattern.permute.xlu0 %v391_v12 }
   0x6   :  { %347 = vmatprep.mubr.msk.f32.mxu1 %vm81_vm3, %v27_v5  ;;  %355 = vmatprep.subr.msk.bf16.mxu0 %vm354_vm2, %v353_v4  ;;  %v33_v6 = vld [vmem:[%s526_s2] sm:$0xff]  ;;  %v25_v10 = vld [vmem:[%s525_s1 + $0x10] sm:$0xff]  ;;  %v34_v13 = vld [vmem:[%s526_s2 + $0x8] sm:$0xff] }
   0x7   :  { %359 = vmatprep.subr.msk.bf16.mxu1 %vm354_vm2, %v353_v4  ;;  %358 = vmatpush3.bf16.msk.msra.mxu0 %vm354_vm2, %v353_v4  ;;  %v29_v11 = vld [vmem:[%s525_s1 + $0x30] sm:$0xff]  ;;  %v36_v14 = vld [vmem:[%s526_s2 + $0x18] sm:$0xff] }
   0x8   :  { %360 = vmatpush3.bf16.msk.msra.mxu1 %vm354_vm2, %v353_v4  ;;  %365 = vset.pattern.permute.xlu1 %v391_v12  ;;  %v26_v15 = vld [vmem:[%s525_s1 + $0x18] sm:$0xff] }
   0x9   :  { %43 = vperm.xlu0 %364, %v33_v6   ;;  %53 = vperm.xlu1 %365, %v35_v9   ;;  %v30_v16 = vld [vmem:[%s525_s1 + $0x38] sm:$0xff] }
   0xa   :  { %342 = vmatmul.mubr.msk.f32.vlgmr.msra.gmra.mrb[0].mxu0 %vm81_vm3, %v24_v7 }
   0xb   :  { %348 = vmatmul.mubr.msk.f32.vlgmr.msra.gmra.mrb[0].mxu1 %vm81_vm3, %v28_v8  ;;  %344 = vmatprep.mubr.msk.f32.mxu0 %vm81_vm3, %v25_v10 }
   0xc   :  { %350 = vmatprep.mubr.msk.f32.mxu1 %vm81_vm3, %v29_v11 }
   0xd   :  { %12 = vsyncpa [#allocation4], 0  ;;  %48 = vperm.xlu0 %364, %v34_v13   ;;  %58 = vperm.xlu1 %365, %v36_v14   ;;  %v223_v17 = vld [vmem:[%s527_s3] sm:$0xff]  ;;  %v224_v18 = vld [vmem:[%s527_s3 + $0x8] sm:$0xff] }
   0xe   :  { %345 = vmatmul.mubr.msk.f32.gmra.mrb[2].mxu0 %vm81_vm3, %v26_v15  ;;  %v37_v19 = vld [vmem:[%s526_s2 + $0x20] sm:$0xff]  ;;  %v225_v20 = vld [vmem:[%s527_s3 + $0x10] sm:$0xff]  ;;  %v38_v21 = vld [vmem:[%s526_s2 + $0x28] sm:$0xff] }
   0xf   :  { %351 = vmatmul.mubr.msk.f32.gmra.mrb[2].mxu1 %vm81_vm3, %v30_v16  ;;  %v226_v22 = vld [vmem:[%s527_s3 + $0x18] sm:$0xff]  ;;  %v39_v23 = vld [vmem:[%s526_s2 + $0x30] sm:$0xff]  ;;  %v227_v24 = vld [vmem:[%s527_s3 + $0x20] sm:$0xff] }
  0x10   :  { %v40_v25 = vld [vmem:[%s526_s2 + $0x38] sm:$0xff]  ;;  %v228_v26 = vld [vmem:[%s527_s3 + $0x28] sm:$0xff]  ;;  %v229_v27 = vld [vmem:[%s527_s3 + $0x30] sm:$0xff]  ;;  %s392_s2 = smov [#allocation3]  }
  0x11   :  { %233 = vperm.xlu0 %364, %v223_v17   ;;  %238 = vperm.xlu1 %365, %v224_v18   ;;  %v230_v28 = vld [vmem:[%s527_s3 + $0x38] sm:$0xff]  ;;  %v292_v29 = vld [vmem:[#allocation2] sm:$0x1]  ;;  %s310_s3 = sshll.u32 %s392_s2, 4  ;;  %s311_s3 = int_to_ptr.vmem [resolvable:$true] %s310_s3 }
  0x12   :  { %s366_s17 = scalar_lea.vmem %s311_s3, 16  ;;  %s370_s18 = scalar_lea.vmem %s311_s3, 32 }
  0x13   :  { %p367_p0 = scmp.ne.s32.totalorder %s311_s3, %s366_s17  ;;  %p371_p1 = scmp.lt.s32.totalorder %s311_s3, %s311_s3 }
  0x14   :  { %p372_p2 = scmp.lt.s32.totalorder %s370_s18, %s366_s17 }
  0x15   :  { %63 = vperm.xlu0 %364, %v37_v19   ;;  %243 = vperm.xlu1 %365, %v225_v20   ;;  %v298_v20 = vlaneseq }
  0x16   :  { %p373_p3 = por %p372_p2, %p371_p1 }
  0x18   :  { %p374_p4 = pnand %p373_p3, %p367_p0 }
  0x19   :  { %68 = vperm.xlu0 %364, %v38_v21   ;;  %248 = vperm.xlu1 %365, %v226_v22  }
  0x1d   :  { %73 = vperm.xlu0 %364, %v39_v23   ;;  %253 = vperm.xlu1 %365, %v227_v24   ;;  %v299_v23 = vshrl.u32 %v298_v20, 7 }
  0x21   :  { %78 = vperm.xlu0 %364, %v40_v25   ;;  %258 = vperm.xlu1 %365, %v228_v26   ;;  %v300_v26 = vsub.s32 0, %v299_v23 }
  0x25   :  { %263 = vperm.xlu0 %364, %v229_v27   ;;  %268 = vperm.xlu1 %365, %v230_v28  }
  0x29   :  { %295 = vperm.xlu0 %364, %v292_v29  }
  0x88   :  { %v44_v30 = vpop.permute.xlu0 %43  ;;  %v54_v31 = vpop.permute.xlu1 %53 }
  0x8c   :  { %v49_v32 = vpop.permute.xlu0 %48  ;;  %v59_v33 = vpop.permute.xlu1 %58 }
  0x90   :  { %v234_v34 = vpop.permute.xlu0 %233  ;;  %v239_v35 = vpop.permute.xlu1 %238 }
  0x94   :  { %v64_v36 = vpop.permute.xlu0 %63  ;;  %v244_v37 = vpop.permute.xlu1 %243 }
  0x98   :  { %v69_v38 = vpop.permute.xlu0 %68  ;;  %v249_v39 = vpop.permute.xlu1 %248 }
  0x9c   :  { %v74_v46 = vpop.permute.xlu0 %73  ;;  %v254_v58 = vpop.permute.xlu1 %253 }
  0xa0   :  { %v79_v2 = vpop.permute.xlu0 %78  ;;  %v259_v7 = vpop.permute.xlu1 %258 }
  0xa4   :  { %v264_v14 = vpop.permute.xlu0 %263  ;;  %v269_v17 = vpop.permute.xlu1 %268 }
  0xa8   :  { %v296_v28 = vpop.permute.xlu0 %295 }
  0xdd   :  { %v343_v40 = vpop.f32.mrb[0].mxu0 }
  0xde   :  { %v349_v41 = vpop.f32.mrb[0].mxu1  ;;  %v182_v42 = vadd.f32 %v343_v40, %v49_v32  ;;  %v176_v43 = vpop.f32.mrb[1].mxu0 }
  0xdf   :  { %v196_v44 = vpop.f32.mrb[1].mxu1  ;;  %v177_v45 = vadd.f32 %v176_v43, %v44_v30  ;;  %v202_v59 = vadd.f32 %v349_v41, %v69_v38  ;;  %v301_v30 = vrot.slane %v296_v28, %v300_v26 }
  0xe0   :  { %v216_v47 = vmax.f32 %v182_v42, 0.0  ;;  %v197_v56 = vadd.f32 %v196_v44, %v64_v36 }
  0xe1   :  { %v215_v48 = vmax.f32 %v177_v45, 0.0  ;;  %v346_v49 = vpop.f32.mrb[2].mxu0  ;;  %v220_v3 = vmax.f32 %v202_v59, 0.0 }
  0xe2   :  { %v352_v50 = vpop.f32.mrb[2].mxu1  ;;  %v272_v51 = vmul.f32 %v239_v35, %v216_v47  ;;  %v192_v52 = vadd.f32 %v346_v49, %v59_v33  ;;  %v186_v53 = vpop.f32.mrb[3].mxu0  ;;  %v219_v63 = vmax.f32 %v197_v56, 0.0 }
  0xe3   :  { %v206_v54 = vpop.f32.mrb[3].mxu1  ;;  %v271_v55 = vmul.f32 %v234_v34, %v215_v48  ;;  %v187_v57 = vadd.f32 %v186_v53, %v54_v31  ;;  %v212_v5 = vadd.f32 %v352_v50, %v79_v2  ;;  %v276_v11 = vmul.f32 %v259_v7, %v220_v3 }
  0xe4   :  { %v218_v61 = vmax.f32 %v192_v52, 0.0  ;;  %v207_v1 = vadd.f32 %v206_v54, %v74_v46  ;;  %v275_v8 = vmul.f32 %v254_v58, %v219_v63 }
  0xe5   :  { %v279_v60 = vadd.f32 %v272_v51, %v271_v55  ;;  %v217_v62 = vmax.f32 %v187_v57, 0.0  ;;  %v222_v12 = vmax.f32 %v212_v5, 0.0 }
  0xe6   :  { %v274_v4 = vmul.f32 %v249_v39, %v218_v61  ;;  %v221_v10 = vmax.f32 %v207_v1, 0.0 }
  0xe7   :  { %v273_v0 = vmul.f32 %v244_v37, %v217_v62  ;;  %v278_v18 = vmul.f32 %v269_v17, %v222_v12 }
  0xe8   :  { %v277_v15 = vmul.f32 %v264_v14, %v221_v10 }
  0xe9   :  { %v280_v6 = vadd.f32 %v279_v60, %v273_v0 }
  0xeb   :  { %v281_v9 = vadd.f32 %v280_v6, %v274_v4 }
  0xed   :  { %v282_v13 = vadd.f32 %v281_v9, %v275_v8 }
  0xef   :  { %v283_v16 = vadd.f32 %v282_v13, %v276_v11 }
  0xf1   :  { %v284_v19 = vadd.f32 %v283_v16, %v277_v15 }
  0xf3   :  { %v285_v21 = vadd.f32 %v284_v19, %v278_v18 }
  0xf5   :  { %v286_v22 = vrot.slane %v285_v21, 4 }
  0xf7   :  { %v287_v24 = vadd.f32 %v286_v22, %v285_v21 }
  0xf9   :  { %v288_v25 = vrot.slane %v287_v24, 2 }
  0xfb   :  { %v289_v27 = vadd.f32 %v288_v25, %v287_v24 }
  0xfd   :  { %v290_v29 = vrot.slane %v289_v27, 1 }
  0xff   :  { %v291_v31 = vadd.f32 %v290_v29, %v289_v27 }
 0x101   :  { %v302_v32 = vadd.f32 %v301_v30, %v291_v31 }
 0x103   :  { %303 = vst [vmem:[#allocation3] sm:$0x1] %v302_v32 }
 0x104   :  { %377 = shalt.err (!%p374_p4)
}
 0x105   :  { %s378_s21 = scalar_lea.hbm %s529_s5, 16 }
 0x106   :  { %p379_p5 = scmp.ne.s32.totalorder %s529_s5, %s378_s21  ;;  %p382_p6 = scmp.lt.u32.totalorder %s378_s21, %s529_s5 }
 0x108   :  { %p384_p7 = pnand %p382_p6, %p379_p5 }
 0x10a   :  { %387 = shalt.err (!%p384_p7)
}
 0x10b   :  { %313 = dma.vmem_to_hbm [thread:$0]  %s311_s3, 16, %s529_s5, [#allocation4]  }
 0x10c   :  { %388 = dma.done.wait [#allocation4], 16  }
 0x10d   :  { %389 = vsyncadd [#allocation4], 4294967280 }
 0x10e   :  { %317 = vsyncpa [#allocation4], 1 }

</bundles_post_ra>
